<compile_context>
chip_gen: v7x
topology: tpu7x:2x2x1
jax: 0.10.0
libtpu: 0.0.40
codegen_flags: <defaults>
</compile_context>

<pallas_src>
import math
import functools

import jax
import jax.numpy as jnp
from jax.experimental import pallas as pl
from jax.experimental.pallas import tpu as pltpu


LANE = 128


# ---------------------------------------------------------------------------
# log_scale: exact port of Evidence.log_scale (plain Python scalar math)
# ---------------------------------------------------------------------------
def log_scale(scale: str, dim: int, further_scale: int = 1) -> float:
    s = 0.0
    if scale is not None and "latent-old" in scale:
        s = 0.5 * (dim * math.log(2 * math.pi) + math.log(dim + 1))
    if scale is not None and "latent-new" in scale:
        s = 0.5 * dim * math.log(4 * math.pi)
    return s + math.log(further_scale)


# ---------------------------------------------------------------------------
# Per-generation tuning (block budget, scoped-VMEM override, megacore hint)
# ---------------------------------------------------------------------------
def _generation_tuning():
    kind = ""
    try:
        kind = jax.devices()[0].device_kind.lower()
    except Exception:
        pass
    if ("v2" in kind) or ("v3" in kind) or ("v4" in kind) or ("v5" in kind):
        # v5e: 16 MiB scoped-VMEM default -> keep <=2 MiB per block
        # (in + out, double-buffered => <= 8 MiB total).
        return {"target_block_bytes": 2 << 20, "vmem_limit_bytes": None,
                "multi_core": False}
    if ("v7" in kind) or ("tpu7" in kind) or ("7x" in kind):
        # v7x: 2 TCs/chip, 3.2 TB/s HBM, 64 MiB physical / 32 MiB scoped VMEM.
        # Bigger blocks amortize the ~0.35 us per-grid-step overhead.
        return {"target_block_bytes": 5 << 20, "vmem_limit_bytes": 30 << 20,
                "multi_core": True}
    # v6e and anything unrecognized.
    return {"target_block_bytes": 3 << 20, "vmem_limit_bytes": None,
            "multi_core": False}


def _row_align(itemsize: int) -> int:
    # Packed-sublane multiple of the I/O dtype: 8 (32-bit), 16 (bf16), 32 (8-bit).
    if itemsize >= 4:
        return 8
    if itemsize == 2:
        return 16
    return 32


# ---------------------------------------------------------------------------
# Pallas kernel: elementwise shift, optional tau*tanh(x/tau), optional clamp.
# tanh -> EUP slot, add/mul/clip -> VPU; compute in f32 regardless of I/O dtype.
# ---------------------------------------------------------------------------
def _evidence_kernel(x_ref, o_ref, *, shift, tau, apply_clip):
    x = x_ref[...].astype(jnp.float32) + jnp.float32(shift)
    if tau is not None:
        t = float(tau)
        inv_t = 1.0 / t                     # trace-time reciprocal: no vdiv in hot loop
        x = jnp.float32(t) * jnp.tanh(x * jnp.float32(inv_t))
    if apply_clip:
        x = jnp.clip(x, -30.0, 30.0)
    o_ref[...] = x.astype(o_ref.dtype)


# ---------------------------------------------------------------------------
# Wrapper: native [N, C] layout (no repack), per-generation tiling
# ---------------------------------------------------------------------------
def evidence_forward(log_q_c: jax.Array,
                     dim: int,
                     scale: str = "latent-new",
                     tau=None,
                     further_scale: int = 1,
                     donate_input: bool = False) -> jax.Array:
    """Apply the Evidence transform to log_q_c of shape [N, C]."""
    rows, cols = log_q_c.shape
    orig_dtype = log_q_c.dtype
    itemsize = jnp.dtype(orig_dtype).itemsize

    shift = log_scale(scale, dim, further_scale)
    # tau*tanh already bounds output to +-tau, so the clamp is redundant if tau<=30.
    apply_clip = (tau is None) or (float(tau) > 30.0)
    kernel = functools.partial(
        _evidence_kernel, shift=shift, tau=tau, apply_clip=apply_clip)

    tune = _generation_tuning()
    target_block_bytes = tune["target_block_bytes"]
    row_align = _row_align(itemsize)

    min_stripe_bytes = row_align * cols * itemsize
    if min_stripe_bytes > target_block_bytes:
        # Very wide C: a single row-aligned stripe already exceeds the budget,
        # so tile the lane axis too (multiples of 128; ragged tail is masked).
        block_rows = min(row_align, rows)
        block_cols = max((target_block_bytes // (row_align * itemsize))
                         // LANE * LANE, LANE)
        block_cols = min(block_cols, pl.cdiv(cols, LANE) * LANE)
    else:
        # Full-extent last dim: legal even for ragged C (block dim == array dim),
        # and avoids any wrapper-side repack / extra HBM passes.
        block_cols = cols
        bytes_per_row = cols * itemsize
        block_rows = max(target_block_bytes // bytes_per_row, row_align)
        block_rows = (block_rows // row_align) * row_align
        if block_rows >= rows:
            block_rows = rows               # single full-array block (small N)
        if tune["multi_core"] and rows * cols * itemsize > (2 << 20):
            # v7x megacore: guarantee >=2 parallel grid steps so both TCs stream.
            half = pl.cdiv(pl.cdiv(rows, 2), row_align) * row_align
            block_rows = max(min(block_rows, half), row_align)
            block_rows = min(block_rows, rows)

    grid = (pl.cdiv(rows, block_rows), pl.cdiv(cols, block_cols))

    compiler_kwargs = {"dimension_semantics": ("parallel", "parallel")}
    if tune["vmem_limit_bytes"] is not None:
        compiler_kwargs["vmem_limit_bytes"] = tune["vmem_limit_bytes"]

    call_kwargs = {}
    if donate_input:
        # Lets XLA reuse the input HBM buffer as the output (free inside a jit
        # where log_q_c is an intermediate; with a donated argument otherwise).
        call_kwargs["input_output_aliases"] = {0: 0}

    # TODO(synk): optionally sweep pipeline_mode=pl.Buffered(3) on the input
    # spec for the largest block sizes (low single-digit % at best).
    out = pl.pallas_call(
        kernel,
        out_shape=jax.ShapeDtypeStruct((rows, cols), orig_dtype),
        grid_spec=pltpu.PrefetchScalarGridSpec(
            num_scalar_prefetch=0,
            grid=grid,
            in_specs=[pl.BlockSpec((block_rows, block_cols), lambda i, j: (i, j))],
            out_specs=pl.BlockSpec((block_rows, block_cols), lambda i, j: (i, j)),
        ),
        compiler_params=pltpu.CompilerParams(**compiler_kwargs),
        **call_kwargs,
    )(log_q_c)
    return out


# ---------------------------------------------------------------------------
# Pure-JAX reference (mirrors the PyTorch forward; compute in f32, cast back)
# ---------------------------------------------------------------------------
def evidence_ref(log_q_c, dim, scale, tau, further_scale=1):
    x = log_q_c.astype(jnp.float32) + log_scale(scale, dim, further_scale)
    if tau is not None:
        x = tau * jnp.tanh(x / tau)
    x = jnp.clip(x, -30.0, 30.0)
    return x.astype(log_q_c.dtype)


if __name__ == "__main__":
    key = jax.random.PRNGKey(0)
    k1, k2, k3 = jax.random.split(key, 3)
    latent_dim = 16

    # Case 1: lane-dense f32, tau-bounded path, input-buffer donation.
    a = 20.0 * jax.random.normal(k1, (128, 128), dtype=jnp.float32)
    ref1 = evidence_ref(a, latent_dim, "latent-new", 10.0)           # ref BEFORE donation
    out1 = jax.block_until_ready(
        evidence_forward(a, latent_dim, scale="latent-new", tau=10.0,
                         donate_input=True))
    assert out1.shape == (128, 128) and out1.dtype == jnp.float32
    assert jnp.max(jnp.abs(out1 - ref1)) < 1e-4, "case1 mismatch"

    # Case 2: bf16 I/O with a ragged class count (full-extent last-dim block).
    b = (20.0 * jax.random.normal(k2, (64, 70), dtype=jnp.float32)).astype(jnp.bfloat16)
    ref2 = evidence_ref(b, latent_dim, "latent-old", 10.0)
    out2 = jax.block_until_ready(
        evidence_forward(b, latent_dim, scale="latent-old", tau=10.0))
    assert out2.shape == b.shape and out2.dtype == b.dtype
    assert jnp.max(jnp.abs(out2.astype(jnp.float32) - ref2.astype(jnp.float32))) < 0.2, \
        "case2 mismatch"

    # Case 3: tau=None -> clamp path, ragged class count, f32.
    c = 40.0 * jax.random.normal(k3, (48, 40), dtype=jnp.float32)
    ref3 = evidence_ref(c, latent_dim, "latent-new", None)
    out3 = jax.block_until_ready(
        evidence_forward(c, latent_dim, scale="latent-new", tau=None))
    assert out3.shape == c.shape and out3.dtype == c.dtype
    assert jnp.max(jnp.abs(out3 - ref3)) < 1e-4, "case3 mismatch"

    print("KERNEL_OK")
</pallas_src>

<mosaic_0001>
module attributes {stable_mosaic.version = 11 : i64} {
  func.func @_evidence_kernel(%arg0: i32, %arg1: i32, %arg2: memref<128x128xf32, #tpu.memory_space<vmem>>, %arg3: memref<128x128xf32, #tpu.memory_space<vmem>>) attributes {dimension_semantics = [#tpu.dimension_semantics<parallel>, #tpu.dimension_semantics<parallel>], iteration_bounds = array<i64: 1, 1>, scalar_prefetch = 0 : i64, scratch_operands = 0 : i64, tpu.core_type = #tpu.core_type<tc>, window_params = [{transform_indices = @transform_0, window_bounds = array<i64: 128, 128>}, {transform_indices = @transform_1, window_bounds = array<i64: 128, 128>}]} {
    %c0 = arith.constant 0 : index
    %c0_0 = arith.constant 0 : index
    %0 = vector.load %arg2[%c0, %c0_0] : memref<128x128xf32, #tpu.memory_space<vmem>>, vector<128x128xf32>
    %cst = arith.constant 20.2481937 : f32
    %1 = vector.broadcast %cst : f32 to vector<128x128xf32>
    %2 = arith.addf %0, %1 : vector<128x128xf32>
    %cst_1 = arith.constant 1.000000e-01 : f32
    %3 = vector.broadcast %cst_1 : f32 to vector<128x128xf32>
    %4 = arith.mulf %2, %3 : vector<128x128xf32>
    %5 = math.tanh %4 : vector<128x128xf32>
    %cst_2 = arith.constant 1.000000e+01 : f32
    %6 = vector.broadcast %cst_2 : f32 to vector<128x128xf32>
    %7 = arith.mulf %6, %5 : vector<128x128xf32>
    %c0_3 = arith.constant 0 : index
    %c0_4 = arith.constant 0 : index
    %8 = vector.load %arg3[%c0_3, %c0_4] : memref<128x128xf32, #tpu.memory_space<vmem>>, vector<128x128xf32>
    tpu.vector_store %arg3[%c0_3, %c0_4], %7 {strides = array<i32>} : memref<128x128xf32, #tpu.memory_space<vmem>>, vector<128x128xf32>,
    return
  }
  func.func @transform_0(%arg0: i32, %arg1: i32) -> (i32, i32) {
    %c0_i32 = arith.constant 0 : i32
    return %arg0, %arg1 : i32, i32
  }
  func.func @transform_1(%arg0: i32, %arg1: i32) -> (i32, i32) {
    %c0_i32 = arith.constant 0 : i32
    return %arg0, %arg1 : i32, i32
  }
}

</mosaic_0001>

<bundles_post_ra>
// kernel: tpu_custom_call.1
= control target key start
LH: loop header
LB: loop body
LE: loop exit
PB: predicated region body
PF: predicated region fallthrough
CT: control target
= control target key end

     0   :  { %6 = vsyncpa [#allocation3], 0  ;;  %s264_s0 = inlined_call_operand.hbm [shape: f32[128,128], index: 0, kind: input, shape index: {}, may-alias: {0,1}]   ;;  %s265_s1 = inlined_call_operand.hbm [shape: f32[128,128], index: 1, kind: output, shape index: {}, may-alias: {0,1}]  }
   0x1   :  { %7 = vsyncpa [#allocation4], 0  ;;  %s220_s6 = smov [#allocation2]   ;;  %s172_s10 = scalar_lea.hbm %s264_s0, 2048 }
   0x2   :  { %s13_s7 = sshll.u32 %s220_s6, 4  ;;  %p173_p0 = scmp.ne.s32.totalorder %s264_s0, %s172_s10  ;;  %s14_s7 = int_to_ptr.vmem [resolvable:$true] %s13_s7 }
   0x3   :  { %p176_p1 = scmp.lt.u32.totalorder %s172_s10, %s264_s0 }
   0x5   :  { %p178_p2 = pnand %p176_p1, %p173_p0 }
   0x7   :  { %181 = shalt.err (!%p178_p2)
}
   0x8   :  { %s182_s15 = scalar_lea.vmem %s14_s7, 2048  ;;  %p187_p4 = scmp.lt.s32.totalorder %s14_s7, %s14_s7 }
   0x9   :  { %p183_p3 = scmp.ne.s32.totalorder %s14_s7, %s182_s15  ;;  %p188_p5 = scmp.lt.s32.totalorder %s182_s15, %s182_s15 }
   0xb   :  { %p189_p6 = por %p188_p5, %p187_p4 }
   0xd   :  { %p190_p7 = pnand %p189_p6, %p183_p3 }
   0xf   :  { %193 = shalt.err (!%p190_p7)
}
  0x10   :  { %s221_s16 = smov 128   ;;  %s222_s17 = smov 8  }
  0x11   :  { %19 = dma.hbm_to_vmem [thread:$0]  %s264_s0, 2048, %s14_s7, [#allocation3], %s221_s16, %s221_s16, %s222_s17  }
  0x12   :  { %216 = dma.done.wait [#allocation3], 2048  }
  0x13   :  { %217 = vsyncadd [#allocation3], 4294965248  ;;  %v23_v0 = vld [vmem:[#allocation2] sm:$0xff]  ;;  %v24_v1 = vld [vmem:[#allocation2 + $0x8] sm:$0xff]  ;;  %s223_s0 = smov [#allocation5]  }
  0x14   :  { %v25_v2 = vld [vmem:[#allocation2 + $0x10] sm:$0xff]  ;;  %v39_v3 = vadd.f32 20.248194, %v23_v0  ;;  %v40_v4 = vadd.f32 20.248194, %v24_v1  ;;  %v26_v6 = vld [vmem:[#allocation2 + $0x18] sm:$0xff] }
  0x15   :  { %v41_v5 = vadd.f32 20.248194, %v25_v2  ;;  %v27_v7 = vld [vmem:[#allocation2 + $0x20] sm:$0xff]  ;;  %v28_v8 = vld [vmem:[#allocation2 + $0x28] sm:$0xff]  ;;  %v42_v12 = vadd.f32 20.248194, %v26_v6 }
  0x16   :  { %v55_v9 = vmul.f32 0.1, %v39_v3  ;;  %v56_v10 = vmul.f32 0.1, %v40_v4  ;;  %v43_v13 = vadd.f32 20.248194, %v27_v7 }
  0x17   :  { %v57_v11 = vmul.f32 0.1, %v41_v5  ;;  %v44_v14 = vadd.f32 20.248194, %v28_v8  ;;  %v29_v15 = vld [vmem:[#allocation2 + $0x30] sm:$0xff]  ;;  %v30_v16 = vld [vmem:[#allocation2 + $0x38] sm:$0xff] }
  0x18   :  { %140 = vtanh.f32 %v55_v9  ;;  %v31_v17 = vld [vmem:[#allocation2 + $0x40] sm:$0xff]  ;;  %v58_v18 = vmul.f32 0.1, %v42_v12  ;;  %v59_v19 = vmul.f32 0.1, %v43_v13  ;;  %v32_v24 = vld [vmem:[#allocation2 + $0x48] sm:$0xff] }
  0x19   :  { %142 = vtanh.f32 %v56_v10  ;;  %v60_v20 = vmul.f32 0.1, %v44_v14  ;;  %v45_v21 = vadd.f32 20.248194, %v29_v15  ;;  %v46_v22 = vadd.f32 20.248194, %v30_v16 }
  0x1a   :  { %144 = vtanh.f32 %v57_v11  ;;  %v47_v23 = vadd.f32 20.248194, %v31_v17  ;;  %v33_v25 = vld [vmem:[#allocation2 + $0x50] sm:$0xff]  ;;  %v34_v26 = vld [vmem:[#allocation2 + $0x58] sm:$0xff]  ;;  %v48_v30 = vadd.f32 20.248194, %v32_v24 }
  0x1b   :  { %146 = vtanh.f32 %v58_v18  ;;  %v61_v27 = vmul.f32 0.1, %v45_v21  ;;  %v62_v28 = vmul.f32 0.1, %v46_v22  ;;  %v49_v31 = vadd.f32 20.248194, %v33_v25 }
  0x1c   :  { %148 = vtanh.f32 %v59_v19  ;;  %v63_v29 = vmul.f32 0.1, %v47_v23  ;;  %v50_v32 = vadd.f32 20.248194, %v34_v26  ;;  %v35_v33 = vld [vmem:[#allocation2 + $0x60] sm:$0xff]  ;;  %v36_v34 = vld [vmem:[#allocation2 + $0x68] sm:$0xff] }
  0x1d   :  { %150 = vtanh.f32 %v60_v20  ;;  %v37_v35 = vld [vmem:[#allocation2 + $0x70] sm:$0xff]  ;;  %v64_v36 = vmul.f32 0.1, %v48_v30  ;;  %v65_v37 = vmul.f32 0.1, %v49_v31  ;;  %v38_v42 = vld [vmem:[#allocation2 + $0x78] sm:$0xff] }
  0x1e   :  { %152 = vtanh.f32 %v61_v27  ;;  %v66_v38 = vmul.f32 0.1, %v50_v32  ;;  %v51_v39 = vadd.f32 20.248194, %v35_v33  ;;  %v52_v40 = vadd.f32 20.248194, %v36_v34 }
  0x1f   :  { %154 = vtanh.f32 %v62_v28  ;;  %v53_v41 = vadd.f32 20.248194, %v37_v35  ;;  %v54_v49 = vadd.f32 20.248194, %v38_v42  ;;  %s124_s20 = sshll.u32 %s223_s0, 4  ;;  %s125_s20 = int_to_ptr.vmem [resolvable:$true] %s124_s20 }
  0x20   :  { %156 = vtanh.f32 %v63_v29  ;;  %v67_v44 = vmul.f32 0.1, %v51_v39  ;;  %v68_v45 = vmul.f32 0.1, %v52_v40  ;;  %s194_s21 = scalar_lea.vmem %s125_s20, 2048  ;;  %p199_p9 = scmp.lt.s32.totalorder %s125_s20, %s125_s20 }
  0x21   :  { %158 = vtanh.f32 %v64_v36  ;;  %v69_v46 = vmul.f32 0.1, %v53_v41  ;;  %v70_v54 = vmul.f32 0.1, %v54_v49  ;;  %p195_p8 = scmp.ne.s32.totalorder %s125_s20, %s194_s21  ;;  %p200_p10 = scmp.lt.s32.totalorder %s194_s21, %s194_s21 }
  0x22   :  { %v141_v43 = vpop.eup %140  ;;  %160 = vtanh.f32 %v65_v37 }
  0x23   :  { %v143_v47 = vpop.eup %142  ;;  %v87_v48 = vmul.f32 10.0, %v141_v43  ;;  %162 = vtanh.f32 %v66_v38  ;;  %p201_p11 = por %p200_p10, %p199_p9 }
  0x24   :  { %v145_v50 = vpop.eup %144  ;;  %v88_v51 = vmul.f32 10.0, %v143_v47  ;;  %164 = vtanh.f32 %v67_v44 }
  0x25   :  { %v147_v52 = vpop.eup %146  ;;  %103 = vst [vmem:[#allocation5] sm:$0xff] %v87_v48  ;;  %v89_v53 = vmul.f32 10.0, %v145_v50  ;;  %166 = vtanh.f32 %v68_v45  ;;  %p202_p12 = pnand %p201_p11, %p195_p8 }
  0x26   :  { %v149_v55 = vpop.eup %148  ;;  %104 = vst [vmem:[#allocation5 + $0x8] sm:$0xff] %v88_v51  ;;  %v90_v56 = vmul.f32 10.0, %v147_v52  ;;  %168 = vtanh.f32 %v69_v46 }
  0x27   :  { %v151_v57 = vpop.eup %150  ;;  %105 = vst [vmem:[#allocation5 + $0x10] sm:$0xff] %v89_v53  ;;  %v91_v58 = vmul.f32 10.0, %v149_v55  ;;  %170 = vtanh.f32 %v70_v54 }
  0x28   :  { %v153_v59 = vpop.eup %152  ;;  %106 = vst [vmem:[#allocation5 + $0x18] sm:$0xff] %v90_v56  ;;  %v92_v60 = vmul.f32 10.0, %v151_v57 }
  0x29   :  { %v155_v61 = vpop.eup %154  ;;  %107 = vst [vmem:[#allocation5 + $0x20] sm:$0xff] %v91_v58  ;;  %v93_v62 = vmul.f32 10.0, %v153_v59 }
  0x2a   :  { %v157_v63 = vpop.eup %156  ;;  %108 = vst [vmem:[#allocation5 + $0x28] sm:$0xff] %v92_v60  ;;  %v94_v0 = vmul.f32 10.0, %v155_v61 }
  0x2b   :  { %v159_v1 = vpop.eup %158  ;;  %109 = vst [vmem:[#allocation5 + $0x30] sm:$0xff] %v93_v62  ;;  %v95_v2 = vmul.f32 10.0, %v157_v63 }
  0x2c   :  { %v161_v3 = vpop.eup %160  ;;  %110 = vst [vmem:[#allocation5 + $0x38] sm:$0xff] %v94_v0  ;;  %v96_v4 = vmul.f32 10.0, %v159_v1 }
  0x2d   :  { %v163_v5 = vpop.eup %162  ;;  %111 = vst [vmem:[#allocation5 + $0x40] sm:$0xff] %v95_v2  ;;  %v97_v6 = vmul.f32 10.0, %v161_v3 }
  0x2e   :  { %v165_v7 = vpop.eup %164  ;;  %112 = vst [vmem:[#allocation5 + $0x48] sm:$0xff] %v96_v4  ;;  %v98_v8 = vmul.f32 10.0, %v163_v5 }
  0x2f   :  { %v167_v9 = vpop.eup %166  ;;  %113 = vst [vmem:[#allocation5 + $0x50] sm:$0xff] %v97_v6  ;;  %v99_v10 = vmul.f32 10.0, %v165_v7 }
  0x30   :  { %v169_v11 = vpop.eup %168  ;;  %114 = vst [vmem:[#allocation5 + $0x58] sm:$0xff] %v98_v8  ;;  %v100_v12 = vmul.f32 10.0, %v167_v9 }
  0x31   :  { %v171_v13 = vpop.eup %170  ;;  %115 = vst [vmem:[#allocation5 + $0x60] sm:$0xff] %v99_v10  ;;  %v101_v14 = vmul.f32 10.0, %v169_v11 }
  0x32   :  { %116 = vst [vmem:[#allocation5 + $0x68] sm:$0xff] %v100_v12  ;;  %v102_v15 = vmul.f32 10.0, %v171_v13 }
  0x33   :  { %117 = vst [vmem:[#allocation5 + $0x70] sm:$0xff] %v101_v14 }
  0x34   :  { %118 = vst [vmem:[#allocation5 + $0x78] sm:$0xff] %v102_v15 }
  0x35   :  { %205 = shalt.err (!%p202_p12)
}
  0x36   :  { %s206_s24 = scalar_lea.hbm %s265_s1, 2048 }
  0x37   :  { %p207_p13 = scmp.ne.s32.totalorder %s265_s1, %s206_s24  ;;  %p210_p0 = scmp.lt.u32.totalorder %s206_s24, %s265_s1 }
  0x39   :  { %p212_p1 = pnand %p210_p0, %p207_p13 }
  0x3b   :  { %215 = shalt.err (!%p212_p1)
}
  0x3c   :  { %130 = dma.vmem_to_hbm [thread:$0]  %s125_s20, 2048, %s265_s1, [#allocation4], %s221_s16, %s221_s16, %s222_s17  }
  0x3d   :  { %218 = dma.done.wait [#allocation4], 2048  }
  0x3e   :  { %219 = vsyncadd [#allocation4], 4294965248 }
  0x3f   :  { %134 = vsyncpa [#allocation3], 1 }
  0x40   :  { %135 = vsyncpa [#allocation4], 1 }

</bundles_post_ra>
